<compile_context>
chip_gen: v7x
topology: tpu7x:2x2x1
jax: 0.10.0
libtpu: 0.0.40
codegen_flags: <defaults>
</compile_context>

<pallas_src>
import functools
import math

import jax
import jax.numpy as jnp
from jax.experimental import pallas as pl
from jax.experimental.pallas import tpu as pltpu

_SMOOTH = 1e-05
_LANE = 128
_SUBLANE = 8
# Cap on the per-step tile (sublane-chunks x 128 lanes).  4096 chunks = 2 MiB
# of f32 per input per step: big enough to keep the ~0.35us grid-step overhead
# around ~10% of the HBM time, small enough that Mosaic's unrolled vector code
# and the f32 compute footprint stay modest.
_MAX_CHUNKS_PER_BLOCK = 4096


def _round_up(x, m):
    return ((x + m - 1) // m) * m


def _device_params():
    """(vmem_limit_bytes, default_num_slices) for the current TPU generation."""
    vmem_bytes = 128 * 1024 * 1024
    try:
        vmem_bytes = int(pltpu.get_tpu_info().vmem_capacity_bytes)
    except Exception:  # conservative defaults if the query is unavailable
        pass
    kind = ""
    try:
        kind = jax.devices()[0].device_kind.lower()
    except Exception:
        pass
    # v7x: 2 TensorCores sharing HBM, 64 MiB VMEM per core -> split the column
    # blocks across both cores.  v5e/v6e: single core, 128 MiB VMEM -> a
    # "parallel" split is just a serial outer loop, so skip it.
    two_cores = ("v7" in kind) or (vmem_bytes <= 64 * 1024 * 1024)
    num_slices = 2 if two_cores else 1
    # Leave generous headroom under physical VMEM for the pipeline buffers.
    vmem_limit = max(16 * 1024 * 1024,
                     min(int(vmem_bytes * 0.45), 96 * 1024 * 1024))
    return vmem_limit, num_slices


# ----------------------------------------------------------------------------
# Dense path: total columns (C*H*W) divisible by 128.
# ----------------------------------------------------------------------------
def _dice_dense_kernel(score_ref, target_ref, out_ref,
                       acc_st, acc_tt, acc_ss, *,
                       apply_sigmoid, r, s_elems, blocks_per_slice, need_mask):
    """Accumulate partial dice sums over (r, 128) channel-0 tiles.

    out_ref : (1, 8, 128) f32 — lanes 0..2 of sublane 0 hold
              [intersect, y_sum, z_sum] after the finalize step.
    acc_*   : small f32 VMEM accumulators (8,128) (or (r,128) for tiny inputs).
    """
    b = pl.program_id(1)
    k = pl.program_id(2)

    @pl.when(jnp.logical_and(b == 0, k == 0))
    def _init():
        acc_st[...] = jnp.zeros_like(acc_st)
        acc_tt[...] = jnp.zeros_like(acc_tt)
        acc_ss[...] = jnp.zeros_like(acc_ss)

    s = score_ref[...].astype(jnp.float32)            # (r, 128)
    if apply_sigmoid:
        s = jax.nn.sigmoid(s)
    t = target_ref[...].astype(jnp.float32)

    if need_mask:
        # Unclamped block id: padded grid steps (bid >= num_blocks) and the
        # ragged channel-0 tail both fail `< s_elems` and contribute zero.
        bid = pl.program_id(0) * blocks_per_slice + k
        row = jax.lax.broadcasted_iota(jnp.int32, s.shape, 0)
        lane = jax.lax.broadcasted_iota(jnp.int32, s.shape, 1)
        keep = (bid * r + row) * _LANE + lane < s_elems
        s = jnp.where(keep, s, 0.0)
        t = jnp.where(keep, t, 0.0)

    # Fold the block's products down to one small tile with plain vreg adds
    # (leading-axis sum over sublane groups).  Cross-lane reduction is
    # deferred to the finalize step.
    if r % _SUBLANE == 0:
        def fold(x):
            return jnp.sum(x.reshape(r // _SUBLANE, _SUBLANE, _LANE), axis=0)
    else:  # tiny inputs: r == full chunk count < 8, accumulator is (r, 128)
        def fold(x):
            return x

    acc_st[...] += fold(s * t)
    acc_tt[...] += fold(t * t)
    acc_ss[...] += fold(s * s)

    @pl.when(jnp.logical_and(b == pl.num_programs(1) - 1,
                             k == pl.num_programs(2) - 1))
    def _finalize():
        intersect = jnp.sum(acc_st[...])
        y_sum = jnp.sum(acc_tt[...])
        z_sum = jnp.sum(acc_ss[...])
        lane = jax.lax.broadcasted_iota(jnp.int32, out_ref.shape, 2)
        out_ref[...] = (jnp.where(lane == 0, intersect, 0.0)
                        + jnp.where(lane == 1, y_sum, 0.0)
                        + jnp.where(lane == 2, z_sum, 0.0))


def _dice_partials_dense(score, target, sigmoid, num_slices, vmem_limit,
                         block_budget_bytes):
    B = score.shape[0]
    S = int(math.prod(score.shape[2:]))               # spatial size (channel 0)
    total_cols = int(math.prod(score.shape[1:]))      # C * S
    nc = total_cols // _LANE                          # 128-lane chunks per row
    ns = pl.cdiv(S, _LANE)                            # chunks covering channel 0

    score3 = score.reshape(B, nc, _LANE)              # free row-major views
    target3 = target.reshape(B, nc, _LANE)

    # Per-input block sizing: 2 inputs x 2 pipeline buffers stay under ~half
    # the scoped VMEM limit, also capped so unrolled vector code stays modest.
    if block_budget_bytes is None:
        block_budget_bytes = vmem_limit
    bytes_per_elem = score.dtype.itemsize + target.dtype.itemsize
    block_elems = max(_SUBLANE * _LANE,
                      block_budget_bytes // (4 * bytes_per_elem))
    r = max(_SUBLANE, (block_elems // _LANE) // _SUBLANE * _SUBLANE)
    r = min(r, _MAX_CHUNKS_PER_BLOCK)
    if nc < _SUBLANE:
        r = nc                                        # full (tiny) chunk dim
    else:
        r = min(r, _round_up(ns, _SUBLANE), (nc // _SUBLANE) * _SUBLANE)
        r = max(r, _SUBLANE)

    num_blocks = pl.cdiv(ns, r)                       # column-chunk blocks/row
    num_slices = max(1, min(num_slices, num_blocks))
    bps = pl.cdiv(num_blocks, num_slices)             # blocks per parallel slice
    grid = (num_slices, B, bps)
    # Mask needed if any grid step's tile could reach past channel 0 (ragged
    # tail, neighbouring channels in the same tile, or padded grid steps).
    need_mask = (num_slices * bps * r * _LANE) != S

    def in_map(p, b, k):
        # Clamp so padded grid steps never DMA past the real blocks; their
        # contribution is zeroed by the in-kernel mask.
        return (b, jnp.minimum(p * bps + k, num_blocks - 1), 0)

    acc_rows = _SUBLANE if r % _SUBLANE == 0 else r
    kernel = functools.partial(
        _dice_dense_kernel, apply_sigmoid=bool(sigmoid), r=r, s_elems=S,
        blocks_per_slice=bps, need_mask=need_mask)

    return pl.pallas_call(
        kernel,
        out_shape=jax.ShapeDtypeStruct((num_slices, _SUBLANE, _LANE),
                                       jnp.float32),
        grid_spec=pltpu.PrefetchScalarGridSpec(
            num_scalar_prefetch=0,
            grid=grid,
            in_specs=[pl.BlockSpec((None, r, _LANE), in_map),
                      pl.BlockSpec((None, r, _LANE), in_map)],
            out_specs=pl.BlockSpec((1, _SUBLANE, _LANE),
                                   lambda p, b, k: (p, 0, 0)),
            scratch_shapes=[pltpu.VMEM((acc_rows, _LANE), jnp.float32)] * 3,
        ),
        compiler_params=pltpu.CompilerParams(
            dimension_semantics=("parallel", "arbitrary", "arbitrary"),
            vmem_limit_bytes=int(vmem_limit)),
    )(score3, target3)


# ----------------------------------------------------------------------------
# Fallback path: total columns not divisible by 128 (rare, odd spatial sizes).
# ----------------------------------------------------------------------------
def _dice_fallback_kernel(score_ref, target_ref, out_ref,
                          acc_st, acc_tt, acc_ss, *,
                          apply_sigmoid, lw, valid_cols, need_mask):
    k = pl.program_id(0)

    @pl.when(k == 0)
    def _init():
        acc_st[...] = jnp.zeros_like(acc_st)
        acc_tt[...] = jnp.zeros_like(acc_tt)
        acc_ss[...] = jnp.zeros_like(acc_ss)

    s = score_ref[...].astype(jnp.float32)            # (B, lw)
    if apply_sigmoid:
        s = jax.nn.sigmoid(s)
    t = target_ref[...].astype(jnp.float32)
    if need_mask:
        lane = jax.lax.broadcasted_iota(jnp.int32, s.shape, 1)
        keep = (k * lw + lane) < valid_cols
        s = jnp.where(keep, s, 0.0)
        t = jnp.where(keep, t, 0.0)
    acc_st[...] += s * t
    acc_tt[...] += t * t
    acc_ss[...] += s * s

    @pl.when(k == pl.num_programs(0) - 1)
    def _finalize():
        intersect = jnp.sum(acc_st[...])
        y_sum = jnp.sum(acc_tt[...])
        z_sum = jnp.sum(acc_ss[...])
        lane = jax.lax.broadcasted_iota(jnp.int32, out_ref.shape, 2)
        out_ref[...] = (jnp.where(lane == 0, intersect, 0.0)
                        + jnp.where(lane == 1, y_sum, 0.0)
                        + jnp.where(lane == 2, z_sum, 0.0))


def _dice_partials_fallback(score, target, sigmoid, vmem_limit):
    B = score.shape[0]
    S = int(math.prod(score.shape[2:]))
    total_cols = int(math.prod(score.shape[1:]))
    score2 = score.reshape(B, total_cols)
    target2 = target.reshape(B, total_cols)

    # Budget for 2 inputs x 2 pipeline buffers + 3 f32 block accumulators.
    bytes_per_elem = score.dtype.itemsize + target.dtype.itemsize + 3 * 4
    budget_elems = max(_LANE, vmem_limit // (4 * bytes_per_elem))
    if B * total_cols <= budget_elems:
        lw = total_cols                               # whole rows in one block
    else:
        lw = max(_LANE, (budget_elems // B) // _LANE * _LANE)
        lw = min(lw, pl.cdiv(S, _LANE) * _LANE)
        if lw > total_cols:
            lw = total_cols
    num_blocks = pl.cdiv(S, lw)
    need_mask = (num_blocks * lw) != S

    kernel = functools.partial(
        _dice_fallback_kernel, apply_sigmoid=bool(sigmoid), lw=lw,
        valid_cols=S, need_mask=need_mask)

    return pl.pallas_call(
        kernel,
        out_shape=jax.ShapeDtypeStruct((1, _SUBLANE, _LANE), jnp.float32),
        grid_spec=pltpu.PrefetchScalarGridSpec(
            num_scalar_prefetch=0,
            grid=(num_blocks,),
            in_specs=[pl.BlockSpec((B, lw), lambda k: (0, k)),
                      pl.BlockSpec((B, lw), lambda k: (0, k))],
            out_specs=pl.BlockSpec((1, _SUBLANE, _LANE), lambda k: (0, 0, 0)),
            scratch_shapes=[pltpu.VMEM((B, lw), jnp.float32)] * 3,
        ),
        compiler_params=pltpu.CompilerParams(
            dimension_semantics=("arbitrary",),
            vmem_limit_bytes=int(vmem_limit)),
    )(score2, target2)


# ----------------------------------------------------------------------------
# Public entry point.
# ----------------------------------------------------------------------------
def mask_dice_loss(net_output, target, weight=None, sigmoid=False, *,
                   num_slices=None, block_budget_bytes=None):
    """JAX/Pallas equivalent of MaskDiceLoss.forward.

    `weight` is accepted but unused — the reference PyTorch forward also
    ignores it.
    """
    del weight
    if net_output.shape != target.shape:
        raise TypeError(
            f"Predict shape ({net_output.shape}) and target {target.shape} "
            f"shape do not match")
    if net_output.ndim < 2:
        raise TypeError("expected inputs of rank >= 2 (N, C, ...)")

    score = net_output
    tgt = target
    # Bool masks stream as 1-byte ints; everything else keeps its dtype and is
    # cast to f32 inside the kernel (no extra wrapper-side HBM pass).
    if score.dtype == jnp.bool_:
        score = score.astype(jnp.int8)
    if tgt.dtype == jnp.bool_:
        tgt = tgt.astype(jnp.int8)

    total_cols = int(math.prod(score.shape[1:]))
    vmem_limit, default_slices = _device_params()
    if num_slices is None:
        num_slices = default_slices

    if total_cols % _LANE == 0:
        partials = _dice_partials_dense(score, tgt, sigmoid, num_slices,
                                        vmem_limit, block_budget_bytes)
    else:
        partials = _dice_partials_fallback(score, tgt, sigmoid, vmem_limit)

    # Tiny epilogue: combine per-slice partial sums into the dice loss.
    sums = jnp.sum(partials[:, 0, :3], axis=0)
    intersect, y_sum, z_sum = sums[0], sums[1], sums[2]
    dice = (2.0 * intersect + _SMOOTH) / (z_sum + y_sum + _SMOOTH)
    return 1.0 - dice


def _reference(net_output, target, sigmoid=False):
    """Pure-JAX reference mirroring the PyTorch module."""
    score = net_output[:, 0].astype(jnp.float32)
    if sigmoid:
        score = jax.nn.sigmoid(score)
    tgt = target[:, 0].astype(jnp.float32)
    intersect = jnp.sum(score * tgt)
    y_sum = jnp.sum(tgt * tgt)
    z_sum = jnp.sum(score * score)
    return 1.0 - (2.0 * intersect + _SMOOTH) / (z_sum + y_sum + _SMOOTH)


if __name__ == "__main__":
    key = jax.random.PRNGKey(0)

    # (shape, sigmoid, dtype, extra kwargs)
    configs = [
        # dense path, one block
        ((2, 4, 16, 16), False, jnp.float32, {}),
        # dense path + sigmoid
        ((2, 4, 16, 16), True, jnp.float32, {}),
        # tiny chunk dim (< 8 sublanes) with lane masking of the channel tail
        ((2, 4, 10, 16), True, jnp.float32, {}),
        # multi-block grid + padded "parallel" grid (forced 2-slice split)
        ((2, 2, 40, 128), False, jnp.float32,
         {"block_budget_bytes": 64 * 1024, "num_slices": 2}),
        # ragged channel-0 tail in the middle of a block
        ((2, 3, 40, 96), True, jnp.float32, {"block_budget_bytes": 64 * 1024}),
        # fallback path (C*H*W not divisible by 128)
        ((2, 3, 20, 24), False, jnp.float32, {}),
        # bf16 inputs stream at half the HBM bytes; cast happens in-kernel
        ((2, 4, 16, 16), False, jnp.bfloat16, {}),
    ]

    for idx, (shape, sig, dt, kwargs) in enumerate(configs):
        k1, k2, key = jax.random.split(key, 3)
        net_output = jax.random.uniform(k1, shape, dtype=jnp.float32).astype(dt)
        target = (jax.random.uniform(k2, shape) > 0.5).astype(dt)
        loss = mask_dice_loss(net_output, target, sigmoid=sig, **kwargs)
        loss = jax.block_until_ready(loss)
        ref = _reference(net_output, target, sigmoid=sig)
        tol = 1e-5 if dt == jnp.float32 else 1e-4
        assert jnp.allclose(loss, ref, atol=tol, rtol=tol), (idx, loss, ref)

    print("KERNEL_OK")
</pallas_src>

<mosaic_0001>
module attributes {stable_mosaic.version = 11 : i64} {
  func.func @_dice_dense_kernel(%arg0: i32, %arg1: i32, %arg2: i32, %arg3: memref<1x8x128xf32, #tpu.memory_space<vmem>>, %arg4: memref<1x8x128xf32, #tpu.memory_space<vmem>>, %arg5: memref<1x8x128xf32, #tpu.memory_space<vmem>>, %arg6: memref<8x128xf32, #tpu.memory_space<vmem>>, %arg7: memref<8x128xf32, #tpu.memory_space<vmem>>, %arg8: memref<8x128xf32, #tpu.memory_space<vmem>>) attributes {dimension_semantics = [#tpu.dimension_semantics<parallel>, #tpu.dimension_semantics<arbitrary>, #tpu.dimension_semantics<arbitrary>], iteration_bounds = array<i64: 1, 2, 1>, scalar_prefetch = 0 : i64, scratch_operands = 3 : i64, tpu.core_type = #tpu.core_type<tc>, window_params = [{transform_indices = @transform_0, window_bounds = array<i64: 1, 8, 128>}, {transform_indices = @transform_1, window_bounds = array<i64: 1, 8, 128>}, {transform_indices = @transform_2, window_bounds = array<i64: 1, 8, 128>}]} {
    %c0_i32 = arith.constant 0 : i32
    %0 = arith.cmpi eq, %arg1, %c0_i32 : i32
    %c0_i32_0 = arith.constant 0 : i32
    %1 = arith.cmpi eq, %arg2, %c0_i32_0 : i32
    %2 = arith.andi %0, %1 : i1
    %3 = arith.extui %2 : i1 to i32
    %c0_i32_1 = arith.constant 0 : i32
    %4 = arith.cmpi ne, %3, %c0_i32_1 : i32
    scf.if %4 {
      %cst_26 = arith.constant 0.000000e+00 : f32
      %48 = vector.broadcast %cst_26 : f32 to vector<8x128xf32>
      %c0_27 = arith.constant 0 : index
      %c0_28 = arith.constant 0 : index
      %49 = vector.load %arg6[%c0_27, %c0_28] : memref<8x128xf32, #tpu.memory_space<vmem>>, vector<8x128xf32>
      tpu.vector_store %arg6[%c0_27, %c0_28], %48 {strides = array<i32>} : memref<8x128xf32, #tpu.memory_space<vmem>>, vector<8x128xf32>,
      %cst_29 = arith.constant 0.000000e+00 : f32
      %50 = vector.broadcast %cst_29 : f32 to vector<8x128xf32>
      %c0_30 = arith.constant 0 : index
      %c0_31 = arith.constant 0 : index
      %51 = vector.load %arg7[%c0_30, %c0_31] : memref<8x128xf32, #tpu.memory_space<vmem>>, vector<8x128xf32>
      tpu.vector_store %arg7[%c0_30, %c0_31], %50 {strides = array<i32>} : memref<8x128xf32, #tpu.memory_space<vmem>>, vector<8x128xf32>,
      %cst_32 = arith.constant 0.000000e+00 : f32
      %52 = vector.broadcast %cst_32 : f32 to vector<8x128xf32>
      %c0_33 = arith.constant 0 : index
      %c0_34 = arith.constant 0 : index
      %53 = vector.load %arg8[%c0_33, %c0_34] : memref<8x128xf32, #tpu.memory_space<vmem>>, vector<8x128xf32>
      tpu.vector_store %arg8[%c0_33, %c0_34], %52 {strides = array<i32>} : memref<8x128xf32, #tpu.memory_space<vmem>>, vector<8x128xf32>,
    } else {
    }
    %c0 = arith.constant 0 : index
    %c0_2 = arith.constant 0 : index
    %c0_3 = arith.constant 0 : index
    %5 = vector.load %arg3[%c0, %c0_2, %c0_3] : memref<1x8x128xf32, #tpu.memory_space<vmem>>, vector<1x8x128xf32>
    %6 = vector.shape_cast %5 : vector<1x8x128xf32> to vector<8x128xf32>
    %c0_4 = arith.constant 0 : index
    %c0_5 = arith.constant 0 : index
    %c0_6 = arith.constant 0 : index
    %7 = vector.load %arg4[%c0_4, %c0_5, %c0_6] : memref<1x8x128xf32, #tpu.memory_space<vmem>>, vector<1x8x128xf32>
    %8 = vector.shape_cast %7 : vector<1x8x128xf32> to vector<8x128xf32>
    %c1_i32 = arith.constant 1 : i32
    %9 = arith.muli %arg0, %c1_i32 : i32
    %10 = arith.addi %9, %arg2 : i32
    %11 = tpu.iota {dimensions = array<i32: 0>} : vector<8x128xi32>
    %12 = tpu.iota {dimensions = array<i32: 1>} : vector<8x128xi32>
    %c8_i32 = arith.constant 8 : i32
    %13 = arith.muli %10, %c8_i32 : i32
    %14 = vector.broadcast %13 : i32 to vector<8x128xi32>
    %15 = arith.addi %14, %11 : vector<8x128xi32>
    %c128_i32 = arith.constant 128 : i32
    %16 = vector.broadcast %c128_i32 : i32 to vector<8x128xi32>
    %17 = arith.muli %15, %16 : vector<8x128xi32>
    %18 = arith.addi %17, %12 : vector<8x128xi32>
    %c256_i32 = arith.constant 256 : i32
    %19 = vector.broadcast %c256_i32 : i32 to vector<8x128xi32>
    %20 = arith.cmpi slt, %18, %19 : vector<8x128xi32>
    %cst = arith.constant 0.000000e+00 : f32
    %21 = vector.broadcast %cst : f32 to vector<8x128xf32>
    %22 = arith.select %20, %6, %21 : vector<8x128xi1>, vector<8x128xf32>
    %cst_7 = arith.constant 0.000000e+00 : f32
    %23 = vector.broadcast %cst_7 : f32 to vector<8x128xf32>
    %24 = arith.select %20, %8, %23 : vector<8x128xi1>, vector<8x128xf32>
    %c0_8 = arith.constant 0 : index
    %c0_9 = arith.constant 0 : index
    %25 = vector.load %arg6[%c0_8, %c0_9] : memref<8x128xf32, #tpu.memory_space<vmem>>, vector<8x128xf32>
    %26 = arith.mulf %22, %24 : vector<8x128xf32>
    %27 = vector.shape_cast %26 : vector<8x128xf32> to vector<1x8x128xf32>
    %cst_10 = arith.constant dense<0.000000e+00> : vector<8x128xf32>
    %28 = vector.multi_reduction <add>, %27, %cst_10 [0] : vector<1x8x128xf32> to vector<8x128xf32>
    %29 = arith.addf %25, %28 : vector<8x128xf32>
    %c0_11 = arith.constant 0 : index
    %c0_12 = arith.constant 0 : index
    %30 = vector.load %arg6[%c0_11, %c0_12] : memref<8x128xf32, #tpu.memory_space<vmem>>, vector<8x128xf32>
    tpu.vector_store %arg6[%c0_11, %c0_12], %29 {strides = array<i32>} : memref<8x128xf32, #tpu.memory_space<vmem>>, vector<8x128xf32>,
    %c0_13 = arith.constant 0 : index
    %c0_14 = arith.constant 0 : index
    %31 = vector.load %arg7[%c0_13, %c0_14] : memref<8x128xf32, #tpu.memory_space<vmem>>, vector<8x128xf32>
    %32 = arith.mulf %24, %24 : vector<8x128xf32>
    %33 = vector.shape_cast %32 : vector<8x128xf32> to vector<1x8x128xf32>
    %cst_15 = arith.constant dense<0.000000e+00> : vector<8x128xf32>
    %34 = vector.multi_reduction <add>, %33, %cst_15 [0] : vector<1x8x128xf32> to vector<8x128xf32>
    %35 = arith.addf %31, %34 : vector<8x128xf32>
    %c0_16 = arith.constant 0 : index
    %c0_17 = arith.constant 0 : index
    %36 = vector.load %arg7[%c0_16, %c0_17] : memref<8x128xf32, #tpu.memory_space<vmem>>, vector<8x128xf32>
    tpu.vector_store %arg7[%c0_16, %c0_17], %35 {strides = array<i32>} : memref<8x128xf32, #tpu.memory_space<vmem>>, vector<8x128xf32>,
    %c0_18 = arith.constant 0 : index
    %c0_19 = arith.constant 0 : index
    %37 = vector.load %arg8[%c0_18, %c0_19] : memref<8x128xf32, #tpu.memory_space<vmem>>, vector<8x128xf32>
    %38 = arith.mulf %22, %22 : vector<8x128xf32>
    %39 = vector.shape_cast %38 : vector<8x128xf32> to vector<1x8x128xf32>
    %cst_20 = arith.constant dense<0.000000e+00> : vector<8x128xf32>
    %40 = vector.multi_reduction <add>, %39, %cst_20 [0] : vector<1x8x128xf32> to vector<8x128xf32>
    %41 = arith.addf %37, %40 : vector<8x128xf32>
    %c0_21 = arith.constant 0 : index
    %c0_22 = arith.constant 0 : index
    %42 = vector.load %arg8[%c0_21, %c0_22] : memref<8x128xf32, #tpu.memory_space<vmem>>, vector<8x128xf32>
    tpu.vector_store %arg8[%c0_21, %c0_22], %41 {strides = array<i32>} : memref<8x128xf32, #tpu.memory_space<vmem>>, vector<8x128xf32>,
    %c1_i32_23 = arith.constant 1 : i32
    %43 = arith.cmpi eq, %arg1, %c1_i32_23 : i32
    %c0_i32_24 = arith.constant 0 : i32
    %44 = arith.cmpi eq, %arg2, %c0_i32_24 : i32
    %45 = arith.andi %43, %44 : i1
    %46 = arith.extui %45 : i1 to i32
    %c0_i32_25 = arith.constant 0 : i32
    %47 = arith.cmpi ne, %46, %c0_i32_25 : i32
    scf.if %47 {
      %c0_26 = arith.constant 0 : index
      %c0_27 = arith.constant 0 : index
      %48 = vector.load %arg6[%c0_26, %c0_27] : memref<8x128xf32, #tpu.memory_space<vmem>>, vector<8x128xf32>
      %49 = vector.shape_cast %48 : vector<8x128xf32> to vector<1x8x128xf32>
      %cst_28 = arith.constant dense<0.000000e+00> : vector<1xf32>
      %50 = vector.multi_reduction <add>, %49, %cst_28 [1, 2] : vector<1x8x128xf32> to vector<1xf32>
      %51 = vector.shape_cast %50 : vector<1xf32> to vector<1x1x1xf32>
      %52 = vector.extract %51[0, 0, 0] : f32 from vector<1x1x1xf32>
      %c0_29 = arith.constant 0 : index
      %c0_30 = arith.constant 0 : index
      %53 = vector.load %arg7[%c0_29, %c0_30] : memref<8x128xf32, #tpu.memory_space<vmem>>, vector<8x128xf32>
      %54 = vector.shape_cast %53 : vector<8x128xf32> to vector<1x8x128xf32>
      %cst_31 = arith.constant dense<0.000000e+00> : vector<1xf32>
      %55 = vector.multi_reduction <add>, %54, %cst_31 [1, 2] : vector<1x8x128xf32> to vector<1xf32>
      %56 = vector.shape_cast %55 : vector<1xf32> to vector<1x1x1xf32>
      %57 = vector.extract %56[0, 0, 0] : f32 from vector<1x1x1xf32>
      %c0_32 = arith.constant 0 : index
      %c0_33 = arith.constant 0 : index
      %58 = vector.load %arg8[%c0_32, %c0_33] : memref<8x128xf32, #tpu.memory_space<vmem>>, vector<8x128xf32>
      %59 = vector.shape_cast %58 : vector<8x128xf32> to vector<1x8x128xf32>
      %cst_34 = arith.constant dense<0.000000e+00> : vector<1xf32>
      %60 = vector.multi_reduction <add>, %59, %cst_34 [1, 2] : vector<1x8x128xf32> to vector<1xf32>
      %61 = vector.shape_cast %60 : vector<1xf32> to vector<1x1x1xf32>
      %62 = vector.extract %61[0, 0, 0] : f32 from vector<1x1x1xf32>
      %63 = tpu.iota {dimensions = array<i32: 2>} : vector<1x8x128xi32>
      %c0_i32_35 = arith.constant 0 : i32
      %64 = vector.broadcast %c0_i32_35 : i32 to vector<1x8x128xi32>
      %65 = arith.cmpi eq, %63, %64 : vector<1x8x128xi32>
      %cst_36 = arith.constant 0.000000e+00 : f32
      %66 = vector.broadcast %52 : f32 to vector<1x8x128xf32>
      %67 = vector.broadcast %cst_36 : f32 to vector<1x8x128xf32>
      %68 = arith.select %65, %66, %67 : vector<1x8x128xi1>, vector<1x8x128xf32>
      %c1_i32_37 = arith.constant 1 : i32
      %69 = vector.broadcast %c1_i32_37 : i32 to vector<1x8x128xi32>
      %70 = arith.cmpi eq, %63, %69 : vector<1x8x128xi32>
      %cst_38 = arith.constant 0.000000e+00 : f32
      %71 = vector.broadcast %57 : f32 to vector<1x8x128xf32>
      %72 = vector.broadcast %cst_38 : f32 to vector<1x8x128xf32>
      %73 = arith.select %70, %71, %72 : vector<1x8x128xi1>, vector<1x8x128xf32>
      %74 = arith.addf %68, %73 : vector<1x8x128xf32>
      %c2_i32 = arith.constant 2 : i32
      %75 = vector.broadcast %c2_i32 : i32 to vector<1x8x128xi32>
      %76 = arith.cmpi eq, %63, %75 : vector<1x8x128xi32>
      %cst_39 = arith.constant 0.000000e+00 : f32
      %77 = vector.broadcast %62 : f32 to vector<1x8x128xf32>
      %78 = vector.broadcast %cst_39 : f32 to vector<1x8x128xf32>
      %79 = arith.select %76, %77, %78 : vector<1x8x128xi1>, vector<1x8x128xf32>
      %80 = arith.addf %74, %79 : vector<1x8x128xf32>
      %c0_40 = arith.constant 0 : index
      %c0_41 = arith.constant 0 : index
      %c0_42 = arith.constant 0 : index
      %81 = vector.load %arg5[%c0_40, %c0_41, %c0_42] : memref<1x8x128xf32, #tpu.memory_space<vmem>>, vector<1x8x128xf32>
      tpu.vector_store %arg5[%c0_40, %c0_41, %c0_42], %80 {strides = array<i32>} : memref<1x8x128xf32, #tpu.memory_space<vmem>>, vector<1x8x128xf32>,
    } else {
    }
    return
  }
  func.func @transform_0(%arg0: i32, %arg1: i32, %arg2: i32) -> (i32, i32, i32) {
    %c1_i32 = arith.constant 1 : i32
    %0 = arith.muli %arg0, %c1_i32 : i32
    %1 = arith.addi %0, %arg2 : i32
    %c0_i32 = arith.constant 0 : i32
    %2 = arith.minsi %1, %c0_i32 : i32
    %c0_i32_0 = arith.constant 0 : i32
    %c0_i32_1 = arith.constant 0 : i32
    return %arg1, %2, %c0_i32_0 : i32, i32, i32
  }
  func.func @transform_1(%arg0: i32, %arg1: i32, %arg2: i32) -> (i32, i32, i32) {
    %c1_i32 = arith.constant 1 : i32
    %0 = arith.muli %arg0, %c1_i32 : i32
    %1 = arith.addi %0, %arg2 : i32
    %c0_i32 = arith.constant 0 : i32
    %2 = arith.minsi %1, %c0_i32 : i32
    %c0_i32_0 = arith.constant 0 : i32
    %c0_i32_1 = arith.constant 0 : i32
    return %arg1, %2, %c0_i32_0 : i32, i32, i32
  }
  func.func @transform_2(%arg0: i32, %arg1: i32, %arg2: i32) -> (i32, i32, i32) {
    %c0_i32 = arith.constant 0 : i32
    %c0_i32_0 = arith.constant 0 : i32
    %c0_i32_1 = arith.constant 0 : i32
    return %arg0, %c0_i32, %c0_i32_0 : i32, i32, i32
  }
}

</mosaic_0001>

<bundles_post_ra>
// kernel: tpu_custom_call.1
= control target key start
LH: loop header
LB: loop body
LE: loop exit
PB: predicated region body
PF: predicated region fallthrough
CT: control target
= control target key end

     0   :  { %7 = vsyncpa [#allocation6], 0  ;;  %s886_s0 = inlined_call_operand.hbm [shape: f32[2,8,128], index: 0, kind: input, shape index: {}]   ;;  %s887_s1 = inlined_call_operand.hbm [shape: f32[2,8,128], index: 1, kind: input, shape index: {}]   ;;  %s888_s2 = inlined_call_operand.hbm [shape: f32[1,8,128], index: 2, kind: output, shape index: {}]  }
   0x1   :  { %9 = vsyncpa [#allocation6 + $0x1], 0 }
   0x2   :  { %10 = vsyncpa [#allocation9], 0 }
   0x3   :  { %12 = vsyncpa [#allocation9 + $0x1], 0 }
   0x4   :  { %13 = vsyncpa [#allocation7], 0  ;;  %s679_s9 = smov 0   ;;  %s681_s10 = smov 0  }
   0x5   :  { %s683_s11 = smov 0   ;;  %s685_s12 = smov 0  }
   0x6   :  { %s687_s13 = smov 0   ;;  %s689_s14 = smov 0  }
   0x7 LB: > { %s422_s15 = sadd.s32 4294967295, %s658_s14   ;;  %s34_s16 = sadd.s32 1, %s654_s13  ;;  %s658_s14 = sphi %s689_s14, %s19_s14   ;;  %s654_s13 = sphi %s687_s13, %s903_s13   ;;  %s650_s12 = sphi %s685_s12, %s902_s12   ;;  %s646_s11 = sphi %s683_s11, %s901_s11   ;;  %s642_s10 = sphi %s681_s10, %s900_s10   ;;  %s638_s9 = sphi %s679_s9, %s899_s9  }
   0x8   : > { %p36_p0 = scmp.ge.s32.totalorder %s34_s16, 2  ;;  %s53_s17 = sadd.s32 1, %s646_s11 }
   0x9   : > { %p60_p1 = scmp.ne.s32.totalorder %s646_s11, %s642_s10  ;;  %p61_p2 = scmp.eq.s32.totalorder %s658_s14, 0 }
   0xa   : > { %s905_s16 = smov (%p36_p0, %s34_s16), 0  ;;  %p66_p4 = scmp.ne.s32.totalorder %s642_s10, %s638_s9 }
   0xb   : > { %p715_p3 = por %p61_p2, %p60_p1  ;;  %s48_s19 = ssub.s32 %s654_s13, %s905_s16 }
   0xc   : > { %p67_p5 = scmp.eq.s32.totalorder %s422_s15, 0  ;;  %p51_p6 = scmp.eq.s32.totalorder %s48_s19, 0 }
   0xd   : > { %p461_p8 = scmp.lt.s32.totalorder %s658_s14, 2  ;;  %s733_s22 = sand.u32 1, %s646_s11  }
   0xe   : > { %p724_p7 = por %p67_p5, %p66_p4  ;;  %s426_s23 = sshll.u32 %s654_s13, 7 }
   0xf   : > { %s730_s21 = scalar_select %p51_p6, %s646_s11, %s53_s17  }
  0x10   : > { %s891_s20 = scalar_select %p724_p7, 1, 0 }
  0x11   : > { %s425_s24 = sshll.u32 %s733_s22, 3  ;;  %s742_s27 = scalar_lea.hbm %s886_s0, %s426_s23 }
  0x12   : > { %s154_s28 = scalar_lea.vmem [#allocation5], %s425_s24  ;;  %p748_p9 = pnand %p461_p8, %p715_p3 }
  0x13   : > { %s165_s29 = sshll.u32 %s154_s28, 4  ;;  %s151_s3 = scalar_lea.sflag [#allocation6], %s733_s22  ;;  %s752_s29 = int_to_ptr.vmem [resolvable:$true] %s165_s29 }
  0x14   : > { %s514_s4 = scalar_lea.hbm %s742_s27, 128  ;;  %p516_p13 = pneg %p748_p9 }
  0x15   : > { %p515_p12 = scmp.ne.s32.totalorder %s742_s27, %s514_s4  ;;  %s519_s7 = scalar_lea.hbm %s886_s0, 256 }
  0x16   : > { %p520_p2 = scmp.lt.u32.totalorder %s742_s27, %s886_s0  ;;  %p521_p3 = scmp.lt.u32.totalorder %s519_s7, %s514_s4 }
  0x17   : > { %p517_p0 = pnand %p516_p13, %p515_p12  ;;  %p523_p5 = scmp.lt.u32.totalorder %s514_s4, %s742_s27 }
  0x18   : > { %p522_p4 = por %p521_p3, %p520_p2 }
  0x19   : > { %p518_p1 = pneg %p517_p0 }
  0x1a   : > { %p524_p6 = por %p523_p5, %p522_p4 }
  0x1c   : > { %p525_p8 = pnand %p524_p6, %p518_p1 }
  0x1e   : > { %528 = shalt.err (!%p525_p8)
}
  0x1f   : > { %s529_s17 = scalar_lea.vmem %s752_s29, 128  ;;  %s660_s18 = smov [#allocation5]  }
  0x20   : > { %p530_p12 = scmp.ne.s32.totalorder %s752_s29, %s529_s17  ;;  %s534_s19 = sshll.u32 %s660_s18, 4  ;;  %s535_s19 = int_to_ptr.vmem [resolvable:$false] %s534_s19 }
  0x21   : > { %s536_s25 = scalar_lea.vmem %s535_s19, 256  ;;  %p537_p11 = scmp.lt.s32.totalorder %s752_s29, %s535_s19 }
  0x22   : > { %p532_p0 = pnand %p530_p12, %p516_p13  ;;  %p538_p2 = scmp.lt.s32.totalorder %s536_s25, %s529_s17 }
  0x24   : > { %p533_p10 = pneg %p532_p0  ;;  %p539_p3 = por %p538_p2, %p537_p11 }
  0x26   : > { %p540_p4 = pnand %p539_p3, %p533_p10 }
  0x28   : > { %543 = shalt.err (!%p540_p4)
}
  0x29   : > { %457 = dma.hbm_to_vmem [thread:$0]  (!%p748_p9), %s742_s27, 128, %s752_s29, %s151_s3  }
  0x2a   : > { %p893_p1 = scmp.lt.s32.totalorder %s658_s14, 3  ;;  %p894_p5 = scmp.ge.s32.totalorder %s658_s14, 1 }
  0x2b   : > { %s795_s5 = scalar_lea.hbm %s887_s1, %s426_s23  ;;  %s176_s6 = scalar_lea.vmem [#allocation8], %s425_s24 }
  0x2c   : > { %p786_p6 = pnand %p894_p5, %p893_p1  ;;  %s187_s7 = sshll.u32 %s176_s6, 4  ;;  %s188_s7 = int_to_ptr.vmem [resolvable:$true] %s187_s7 }
  0x2d   : > { %s173_s27 = scalar_lea.sflag [#allocation9], %s733_s22  ;;  %s544_s29 = scalar_lea.hbm %s795_s5, 128 }
  0x2e   : > { %s895_s26 = scalar_select %p786_p6, 1, 0 }
  0x2f   : > { %p545_p10 = scmp.ne.s32.totalorder %s795_s5, %s544_s29  ;;  %s549_s23 = scalar_lea.hbm %s887_s1, 256 }
  0x30   : > { %p550_p12 = scmp.lt.u32.totalorder %s795_s5, %s887_s1  ;;  %p551_p0 = scmp.lt.u32.totalorder %s549_s23, %s544_s29 }
  0x31   : > { %p547_p11 = pnand %p545_p10, %p516_p13  ;;  %p553_p3 = scmp.lt.u32.totalorder %s544_s29, %s795_s5 }
  0x32   : > { %p552_p2 = por %p551_p0, %p550_p12 }
  0x33   : > { %p548_p8 = pneg %p547_p11 }
  0x34   : > { %p554_p4 = por %p553_p3, %p552_p2 }
  0x36   : > { %p555_p1 = pnand %p554_p4, %p548_p8 }
  0x38   : > { %558 = shalt.err (!%p555_p1)
}
  0x39   : > { %s559_s22 = scalar_lea.vmem %s188_s7, 128  ;;  %s661_s24 = smov [#allocation8]  }
  0x3a   : > { %p560_p5 = scmp.ne.s32.totalorder %s188_s7, %s559_s22  ;;  %s564_s18 = sshll.u32 %s661_s24, 4  ;;  %s565_s18 = int_to_ptr.vmem [resolvable:$false] %s564_s18 }
  0x3b   : > { %s566_s19 = scalar_lea.vmem %s565_s18, 256  ;;  %p567_p7 = scmp.lt.s32.totalorder %s188_s7, %s565_s18 }
  0x3c   : > { %p562_p10 = pnand %p560_p5, %p516_p13  ;;  %p568_p6 = scmp.lt.s32.totalorder %s566_s19, %s559_s22 }
  0x3e   : > { %p563_p11 = pneg %p562_p10  ;;  %p569_p0 = por %p568_p6, %p567_p7 }
  0x40   : > { %p570_p12 = pnand %p569_p0, %p563_p11 }
  0x42   : > { %573 = shalt.err (!%p570_p12)
}
  0x43   : > { %460 = dma.hbm_to_vmem [thread:$0]  (!%p748_p9), %s795_s5, 128, %s188_s7, %s173_s27  }
  0x44   : > { %p896_p8 = scmp.ne.s32.totalorder %s895_s26, 0 }
  0x45   : > { %s198_s25 = sand.u32 (!%p896_p8), 1, %s642_s10   ;;  %p897_p13 = scmp.ne.s32.totalorder (!%p896_p8), %s891_s20, 0 }
  0x46   : > { %196 = sbr.rel (%p896_p8) target bundleno = 351 (0x15f), region = 28  ;;  %s430_s28 = sshll.u32 (!%p896_p8), %s198_s25, 3 }
  0x47   : > { %s199_s4 = scalar_lea.sflag (!%p896_p8), [#allocation6], %s198_s25  ;;  %s202_s6 = scalar_lea.vmem (!%p896_p8), [#allocation5], %s430_s28 }
  0x4d   : > { %625 = dma.done.wait (%p897_p13), %s199_s4, 128  }
  0x4e   : > { %627 = vsyncadd (%p897_p13), %s199_s4, 4294967168  ;;  %s208_s29 = scalar_lea.sflag [#allocation9], %s198_s25  ;;  %s211_s3 = scalar_lea.vmem [#allocation8], %s430_s28 }
  0x4f   : > { %629 = dma.done.wait (%p897_p13), %s208_s29, 128  }
  0x50   : > { %631 = vsyncadd (%p897_p13), %s208_s29, 4294967168  ;;  %p238_p7 = scmp.eq.s32.totalorder %s650_s12, 0 }
  0x51   : > { %v662_v0 = vmov (%p238_p7), 0.0  }
  0x52   : > { %243 = sbr.rel (!%p238_p7) target bundleno = 89 (0x59), region = 40  ;;  %244 = vst [vmem:[#allocation2] sm:$0xff] (%p238_p7), %v662_v0  ;;  %245 = vst [vmem:[#allocation3] sm:$0xff] (%p238_p7), %v662_v0 }
  0x53   : > { %246 = vst [vmem:[#allocation4] sm:$0xff] (%p238_p7), %v662_v0 }
  0x59 PF: > { %v250_v1 = vlaneseq  ;;  %p277_p9 = scmp.eq.s32.totalorder %s650_s12, 1  ;;  %v247_v5 = vld [vmem:[%s202_s6] sm:$0xff]  ;;  %v248_v6 = vld [vmem:[%s211_s3] sm:$0xff] }
  0x5a   : > { %v262_v10 = vld [vmem:[#allocation2] sm:$0xff]  ;;  %v267_v11 = vld [vmem:[#allocation3] sm:$0xff]  ;;  %v272_v12 = vld [vmem:[#allocation4] sm:$0xff] }
  0x5b   : > { %v251_v2 = vshrl.u32 %v250_v1, 7  ;;  %v832_v3 = vand.u32 127, %v250_v1 }
  0x5d   : > { %v257_v4 = vmul.u32 128, %v251_v2  ;;  %vm312_vm1 = vcmp.eq.s32.totalorder (%p277_p9), %v832_v3, 0  ;;  %vm315_vm2 = vcmp.eq.s32.totalorder (%p277_p9), %v832_v3, 1  ;;  %vm319_vm3 = vcmp.eq.s32.totalorder (%p277_p9), %v832_v3, 2 }
  0x5f   : > { %v258_v7 = vadd.s32 %v257_v4, %v832_v3 }
  0x61   : > { %vm259_vm0 = vcmp.lt.s32.totalorder %v258_v7, 256 }
  0x62   : > { %v260_v8 = vsel %vm259_vm0, %v247_v5, 0.0  ;;  %v261_v9 = vsel %vm259_vm0, %v248_v6, 0.0  ;;  %281 = sbr.rel (!%p277_p9) target bundleno = 326 (0x146), region = 44 }
  0x63   : > { %v263_v13 = vmul.f32 %v261_v9, %v260_v8  ;;  %v268_v14 = vmul.f32 %v261_v9, %v261_v9  ;;  %v273_v15 = vmul.f32 %v260_v8, %v260_v8 }
  0x65   : > { %v265_v16 = vadd.f32 %v263_v13, %v262_v10  ;;  %v270_v17 = vadd.f32 %v268_v14, %v267_v11  ;;  %v275_v18 = vadd.f32 %v273_v15, %v272_v12 }
  0x67   : > { %266 = vst [vmem:[#allocation2] sm:$0xff] %v265_v16  ;;  %271 = vst [vmem:[#allocation3] sm:$0xff] %v270_v17 }
  0x68   : > { %276 = vst [vmem:[#allocation4] sm:$0xff] %v275_v18 }
  0x6e   : > { %v282_v20 = vld [vmem:[#allocation2] sm:$0xff]  ;;  %v292_v21 = vld [vmem:[#allocation3] sm:$0xff] }
  0x6f   : > { %v302_v19 = vld [vmem:[#allocation4] sm:$0xff]  ;;  %283 = vadd.xlane.f32.xlu0 %v282_v20 }
  0x70   : > { %303 = vadd.xlane.f32.xlu1 %v302_v19 }
  0x73   : > { %293 = vadd.xlane.f32.xlu0 %v292_v21 }
  0xfc   : > { %v284_v23 = vpop.xlane.xlu0 %283 }
  0xfd   : > { %v304_v22 = vpop.xlane.xlu1 %303  ;;  %v285_v25 = vrot.slane %v284_v23, 4 }
  0xfe   : > { %v305_v24 = vrot.slane %v304_v22, 4 }
  0xff   : > { %v286_v27 = vadd.f32 %v285_v25, %v284_v23 }
 0x100   : > { %v306_v26 = vadd.f32 %v305_v24, %v304_v22  ;;  %v294_v28 = vpop.xlane.xlu0 %293 }
 0x101   : > { %v287_v30 = vrot.slane %v286_v27, 2  ;;  %v295_v31 = vrot.slane %v294_v28, 4 }
 0x102   : > { %v307_v29 = vrot.slane %v306_v26, 2 }
 0x103   : > { %v296_v32 = vadd.f32 %v295_v31, %v294_v28  ;;  %v288_v33 = vadd.f32 %v287_v30, %v286_v27 }
 0x104   : > { %v308_v34 = vadd.f32 %v307_v29, %v306_v26 }
 0x105   : > { %v297_v35 = vrot.slane %v296_v32, 2  ;;  %v289_v36 = vrot.slane %v288_v33, 1 }
 0x106   : > { %v309_v39 = vrot.slane %v308_v34, 1 }
 0x107   : > { %v298_v37 = vadd.f32 %v297_v35, %v296_v32  ;;  %v290_v38 = vadd.f32 %v289_v36, %v288_v33 }
 0x108   : > { %v310_v42 = vadd.f32 %v309_v39, %v308_v34 }
 0x109   : > { %440 = vpush %v290_v38  ;;  %v299_v40 = vrot.slane %v298_v37, 1 }
 0x10b   : > { %v300_v41 = vadd.f32 %v299_v40, %v298_v37 }
 0x10d   : > { %442 = vpush %v300_v41 }
 0x10e   : > { %444 = vpush %v310_v42 }
 0x13a   : > { %s441_s12 = spop %440 }
 0x13b   : > { %v313_v43 = vstv %s441_s12 }
 0x13c   : > { %v314_v45 = vsel %vm312_vm1, %v313_v43, 0.0 }
 0x13e   : > { %s443_s20 = spop %442 }
 0x13f   : > { %v316_v44 = vstv %s443_s20  ;;  %s445_s30 = spop %444 }
 0x140   : > { %v317_v46 = vsel %vm315_vm2, %v316_v44, 0.0  ;;  %v320_v47 = vstv %s445_s30 }
 0x141   : > { %v318_v48 = vadd.f32 %v317_v46, %v314_v45  ;;  %v321_v49 = vsel %vm319_vm3, %v320_v47, 0.0 }
 0x143   : > { %v322_v50 = vadd.f32 %v321_v49, %v318_v48 }
 0x145   : > { %323 = vst [vmem:[#allocation10] sm:$0xff] %v322_v50 }
 0x146 PF: > { %p842_p6 = scmp.eq.s32.totalorder %s422_s15, 1  ;;  %s663_s5 = smov [#allocation10]  }
 0x147   : > { %s333_s7 = sshll.u32 %s663_s5, 4  ;;  %s334_s7 = int_to_ptr.vmem [resolvable:$true] %s333_s7 }
 0x148   : > { %s574_s27 = scalar_lea.vmem %s334_s7, 128  ;;  %p581_p1 = scmp.lt.s32.totalorder %s334_s7, %s334_s7 }
 0x149   : > { %p575_p2 = scmp.ne.s32.totalorder %s334_s7, %s574_s27  ;;  %p582_p5 = scmp.lt.s32.totalorder %s574_s27, %s574_s27 }
 0x14b   : > { %p576_p3 = pnand %p575_p2, %p842_p6  ;;  %p583_p10 = por %p582_p5, %p581_p1 }
 0x14d   : > { %p577_p4 = pneg %p576_p3 }
 0x14f   : > { %p584_p11 = pnand %p583_p10, %p577_p4 }
 0x151   : > { %587 = shalt.err (!%p584_p11)
}
 0x152   : > { %s588_s15 = scalar_lea.hbm %s888_s2, 128 }
 0x153   : > { %p589_p0 = scmp.ne.s32.totalorder %s888_s2, %s588_s15  ;;  %p594_p13 = scmp.lt.u32.totalorder %s588_s15, %s888_s2 }
 0x155   : > { %p590_p12 = pnand %p589_p0, %p842_p6 }
 0x157   : > { %p591_p8 = pneg %p590_p12 }
 0x159   : > { %p596_p7 = pnand %p594_p13, %p591_p8 }
 0x15b   : > { %599 = shalt.err (!%p596_p7)
}
 0x15c   : > { %451 = dma.vmem_to_hbm [thread:$0]  (%p842_p6), %s334_s7, 128, %s888_s2, [#allocation7]  }
 0x15d   : > { %633 = dma.done.wait (%p842_p6), [#allocation7], 128  }
 0x15e   : > { %635 = vsyncadd (%p842_p6), [#allocation7], 4294967168 }
 0x15f PF: > { %s19_s14 = sadd.s32 1, %s658_s14   ;;  %s899_s9 = smov %s642_s10 }
 0x160   : > { %p16_p9 = scmp.ge.s32.totalorder %s19_s14, 4   ;;  %s900_s10 = smov %s646_s11 }
 0x161   : > { %s901_s11 = smov %s730_s21  ;;  %s902_s12 = smov %s654_s13 }
 0x162   : > { %s903_s13 = smov %s905_s16  ;;  %18 = sbr.rel (!%p16_p9) target bundleno = 7 (0x7), region = 87 }
 0x169   :  { %346 = vsyncpa [#allocation6], 1 }
 0x16a   :  { %348 = vsyncpa [#allocation6 + $0x1], 1 }
 0x16b   :  { %349 = vsyncpa [#allocation9], 1 }
 0x16c   :  { %351 = vsyncpa [#allocation9 + $0x1], 1 }
 0x16d   :  { %352 = vsyncpa [#allocation7], 1 }
 0x16e   :  { %354 = vsyncpa [#allocation7 + $0x1], 1 }

</bundles_post_ra>
